<compile_context>
chip_gen: v5e
topology: v5e:2x2
jax: 0.10.0
libtpu: 0.0.40
codegen_flags: <defaults>
</compile_context>

<pallas_src>
import functools

import jax
import jax.numpy as jnp
from jax.experimental import pallas as pl
from jax.experimental.pallas import tpu as pltpu

_SLOPE = 0.1  # LeakyReLU negative_slope


def _round_up(x, m):
    return (x + m - 1) // m * m


def _device_kind():
    try:
        return jax.devices()[0].device_kind.lower()
    except Exception:
        return ""


def _tile_budget():
    """Per-generation tile caps and VMEM limit (bytes)."""
    kind = _device_kind()
    if "v7" in kind:
        # 64 MiB physical VMEM: smaller tiles, leave compiler headroom.
        return dict(tm_cap=256, tn_cap=256, tk_cap=512, vmem_limit=48 * 1024 * 1024)
    if "v6" in kind:
        # 128 MiB VMEM: bigger blocks amortize per-grid-step overhead.
        return dict(tm_cap=512, tn_cap=512, tk_cap=1024, vmem_limit=100 * 1024 * 1024)
    if "v5" in kind:
        return dict(tm_cap=512, tn_cap=512, tk_cap=512, vmem_limit=100 * 1024 * 1024)
    # Unknown TPU: conservative settings that fit 64 MiB parts.
    return dict(tm_cap=256, tn_cap=256, tk_cap=512, vmem_limit=48 * 1024 * 1024)


def _pick_tm(m, tm_cap, sublane=16):
    """Pick an M tile (multiple of 16 for bf16 packing) minimizing padding."""
    m_aligned = _round_up(m, sublane)
    if m_aligned <= tm_cap:
        return m_aligned
    cands = sorted({c for c in (tm_cap, 384, 256, 128) if c <= tm_cap}, reverse=True)
    return min(cands, key=lambda t: (_round_up(m_aligned, t) - m_aligned, cands.index(t)))


def _largest_dividing_tile(dim_pad, cap, unit=128):
    """Largest multiple of `unit` that divides dim_pad and is <= cap."""
    best = unit
    t = unit
    while t <= min(cap, dim_pad):
        if dim_pad % t == 0:
            best = t
        t += unit
    return min(best, dim_pad)


# --------------------------------------------------------------------------
# Kernels
# --------------------------------------------------------------------------
def _mlp_kernel_acc(x_ref, w_ref, b_ref, o_ref):
    """K-tiled path: accumulate directly into the resident f32 output block."""
    k = pl.program_id(2)

    @pl.when(k == 0)
    def _():
        o_ref[...] = jnp.zeros_like(o_ref)

    o_ref[...] += jnp.dot(x_ref[...], w_ref[...],
                          preferred_element_type=jnp.float32)

    @pl.when(k == pl.num_programs(2) - 1)
    def _():
        y = o_ref[...] + b_ref[...]
        # LeakyReLU(0.1): max(y, 0.1*y) is exact for slope in (0,1).
        o_ref[...] = jnp.maximum(y, _SLOPE * y)
        # SharedDropout: identity in eval mode / p=0 -> no-op.


def _mlp_kernel_single_k(x_ref, w_ref, b_ref, o_ref):
    """Single-K-block path: no accumulator / epilogue gating needed."""
    y = jnp.dot(x_ref[...], w_ref[...],
                preferred_element_type=jnp.float32) + b_ref[...]
    o_ref[...] = jnp.maximum(y, _SLOPE * y)


# --------------------------------------------------------------------------
# Parameter prep (one-time, outside the per-call forward path)
# --------------------------------------------------------------------------
def prepare_mlp_params(weight, bias, compute_dtype=jnp.bfloat16):
    """weight: (n_out, n_in), bias: (n_out,).

    Returns (wt_padded, bias_padded, n_out) with the weight pre-transposed to
    (k_pad, n_pad), zero-padded to multiples of 128 and cast to the MXU compute
    dtype; bias stays f32 (added after f32 accumulation)."""
    n_out, n_in = weight.shape
    k_pad = _round_up(n_in, 128)
    n_pad = _round_up(n_out, 128)
    wt = jnp.asarray(weight).T
    if (k_pad, n_pad) != (n_in, n_out):
        wt = jnp.pad(wt, ((0, k_pad - n_in), (0, n_pad - n_out)))
    wt = wt.astype(compute_dtype)
    b2d = jnp.asarray(bias, jnp.float32).reshape(1, n_out)
    if n_pad != n_out:
        b2d = jnp.pad(b2d, ((0, 0), (0, n_pad - n_out)))
    return wt, b2d, n_out


# --------------------------------------------------------------------------
# Forward
# --------------------------------------------------------------------------
@functools.partial(jax.jit,
                   static_argnames=("n_out", "tm", "tn", "tk", "vmem_limit"))
def _mlp_forward_padded(x, wt, b2d, *, n_out, tm, tn, tk, vmem_limit):
    batch, seq, n_in = x.shape
    k_pad, n_pad = wt.shape
    m = batch * seq
    m_pad = _round_up(m, tm)

    x2d = x.reshape(m, n_in)
    if (m_pad, k_pad) != (m, n_in):
        x2d = jnp.pad(x2d, ((0, m_pad - m), (0, k_pad - n_in)))
    x2d = x2d.astype(wt.dtype)

    m_tiles, n_tiles, k_tiles = m_pad // tm, n_pad // tn, k_pad // tk
    grid = (m_tiles, n_tiles, k_tiles)
    kernel = _mlp_kernel_single_k if k_tiles == 1 else _mlp_kernel_acc

    itemsize = jnp.dtype(wt.dtype).itemsize
    # Weight is re-streamed once per M tile when its block index varies;
    # x is re-streamed once per N tile; output (f32) written once.
    w_reads = m_tiles if (n_tiles * k_tiles > 1) else 1
    cost = pl.CostEstimate(
        flops=2 * m_pad * k_pad * n_pad,
        transcendentals=0,
        bytes_accessed=(x2d.size * itemsize * n_tiles
                        + wt.size * itemsize * w_reads
                        + b2d.size * 4 * m_tiles
                        + m_pad * n_pad * 4),
    )

    out2d = pl.pallas_call(
        kernel,
        out_shape=jax.ShapeDtypeStruct((m_pad, n_pad), jnp.float32),
        grid_spec=pltpu.PrefetchScalarGridSpec(
            num_scalar_prefetch=0,
            grid=grid,
            in_specs=[
                pl.BlockSpec((tm, tk), lambda i, j, k: (i, k)),   # activations
                pl.BlockSpec((tk, tn), lambda i, j, k: (k, j)),   # weight (pre-transposed)
                pl.BlockSpec((1, tn), lambda i, j, k: (0, j)),    # bias
            ],
            out_specs=pl.BlockSpec((tm, tn), lambda i, j, k: (i, j)),
        ),
        compiler_params=pltpu.CompilerParams(
            dimension_semantics=("parallel", "parallel", "arbitrary"),
            vmem_limit_bytes=vmem_limit,
        ),
        cost_estimate=cost,
    )(x2d, wt, b2d)

    return out2d[:m, :n_out].reshape(batch, seq, n_out)


def mlp_forward(x, wt_padded, b_padded, n_out, *, tm=None, tn=None, tk=None):
    """x: (batch, seq, n_in). wt_padded/b_padded come from prepare_mlp_params."""
    batch, seq, _ = x.shape
    m = batch * seq
    k_pad, n_pad = wt_padded.shape
    budget = _tile_budget()
    if tm is None:
        tm = _pick_tm(m, budget["tm_cap"])
    if tn is None:
        tn = _largest_dividing_tile(n_pad, budget["tn_cap"])
    if tk is None:
        tk = _largest_dividing_tile(k_pad, budget["tk_cap"])
    return _mlp_forward_padded(x, wt_padded, b_padded, n_out=n_out,
                               tm=tm, tn=tn, tk=tk,
                               vmem_limit=budget["vmem_limit"])


def make_orthogonal_weight(key, n_out, n_in):
    """Deterministic orthogonal init (mirrors nn.init.orthogonal_)."""
    a = jax.random.normal(key, (max(n_out, n_in), min(n_out, n_in)), jnp.float32)
    q, r = jnp.linalg.qr(a)
    q = q * jnp.sign(jnp.diag(r))[None, :]
    if n_out < n_in:
        q = q.T
    return q[:n_out, :n_in]


def _leaky_relu_ref(y):
    return jnp.where(y >= 0, y, _SLOPE * y)


if __name__ == "__main__":
    key = jax.random.PRNGKey(0)
    k_x, k_w = jax.random.split(key)

    batch, seq, n_in, n_out = 2, 8, 32, 32

    x = jax.random.normal(k_x, (batch, seq, n_in), jnp.float32)
    weight = make_orthogonal_weight(k_w, n_out, n_in)   # nn.init.orthogonal_
    bias = jnp.zeros((n_out,), jnp.float32)             # nn.init.zeros_

    # One-time parameter prep (transpose / pad / bf16 cast hoisted out of fwd).
    wt, bp, _ = prepare_mlp_params(weight, bias)
    out = mlp_forward(x, wt, bp, n_out)
    jax.block_until_ready(out)

    # Reference in plain JAX with matching bf16 input rounding, f32 accumulation.
    xb = x.astype(jnp.bfloat16).astype(jnp.float32)
    wb = weight.astype(jnp.bfloat16).astype(jnp.float32)
    ref = _leaky_relu_ref(xb.reshape(-1, n_in) @ wb.T + bias).reshape(batch, seq, n_out)
    assert jnp.allclose(out, ref, atol=1e-3, rtol=1e-3), \
        float(jnp.abs(out - ref).max())

    # Also exercise the K-tiled accumulate path (k_pad = 256, forced tk = 128).
    n_in2, n_out2 = 256, 64
    x2 = jax.random.normal(jax.random.PRNGKey(1), (batch, seq, n_in2), jnp.float32)
    w2 = make_orthogonal_weight(jax.random.PRNGKey(2), n_out2, n_in2)
    b2 = jnp.zeros((n_out2,), jnp.float32)
    wt2, bp2, _ = prepare_mlp_params(w2, b2)
    out2 = mlp_forward(x2, wt2, bp2, n_out2, tk=128)
    jax.block_until_ready(out2)
    xb2 = x2.astype(jnp.bfloat16).astype(jnp.float32)
    wb2 = w2.astype(jnp.bfloat16).astype(jnp.float32)
    ref2 = _leaky_relu_ref(xb2.reshape(-1, n_in2) @ wb2.T + b2).reshape(batch, seq, n_out2)
    assert jnp.allclose(out2, ref2, atol=2e-3, rtol=2e-3), \
        float(jnp.abs(out2 - ref2).max())

    print("KERNEL_OK")
</pallas_src>

<mosaic_0001>
module attributes {stable_mosaic.version = 11 : i64} {
  func.func @_mlp_kernel_single_k(%arg0: i32, %arg1: i32, %arg2: i32, %arg3: memref<16x128xbf16, #tpu.memory_space<vmem>>, %arg4: memref<128x128xbf16, #tpu.memory_space<vmem>>, %arg5: memref<1x128xf32, #tpu.memory_space<vmem>>, %arg6: memref<16x128xf32, #tpu.memory_space<vmem>>) attributes {dimension_semantics = [#tpu.dimension_semantics<parallel>, #tpu.dimension_semantics<parallel>, #tpu.dimension_semantics<arbitrary>], iteration_bounds = array<i64: 1, 1, 1>, scalar_prefetch = 0 : i64, scratch_operands = 0 : i64, tpu.core_type = #tpu.core_type<tc>, window_params = [{transform_indices = @transform_0, window_bounds = array<i64: 16, 128>}, {transform_indices = @transform_1, window_bounds = array<i64: 128, 128>}, {transform_indices = @transform_2, window_bounds = array<i64: 1, 128>}, {transform_indices = @transform_3, window_bounds = array<i64: 16, 128>}]} {
    %c0 = arith.constant 0 : index
    %c0_0 = arith.constant 0 : index
    %0 = vector.load %arg3[%c0, %c0_0] : memref<16x128xbf16, #tpu.memory_space<vmem>>, vector<16x128xbf16>
    %c0_1 = arith.constant 0 : index
    %c0_2 = arith.constant 0 : index
    %1 = vector.load %arg4[%c0_1, %c0_2] : memref<128x128xbf16, #tpu.memory_space<vmem>>, vector<128x128xbf16>
    %cst = arith.constant dense<0.000000e+00> : vector<16x128xf32>
    %2 = tpu.matmul %0, %1, %cst {dimension_numbers = #tpu.dot_dimension_numbers<[1], [0], [0], [1], [0, 0, 1, 1], [], []>} : vector<16x128xbf16>, vector<128x128xbf16>, vector<16x128xf32> -> vector<16x128xf32>
    %c0_3 = arith.constant 0 : index
    %c0_4 = arith.constant 0 : index
    %3 = vector.load %arg5[%c0_3, %c0_4] : memref<1x128xf32, #tpu.memory_space<vmem>>, vector<1x128xf32>
    %4 = vector.broadcast %3 : vector<1x128xf32> to vector<16x128xf32>
    %5 = arith.addf %2, %4 : vector<16x128xf32>
    %cst_5 = arith.constant 1.000000e-01 : f32
    %6 = vector.broadcast %cst_5 : f32 to vector<16x128xf32>
    %7 = arith.mulf %6, %5 : vector<16x128xf32>
    %8 = arith.maximumf %5, %7 : vector<16x128xf32>
    %c0_6 = arith.constant 0 : index
    %c0_7 = arith.constant 0 : index
    %9 = vector.load %arg6[%c0_6, %c0_7] : memref<16x128xf32, #tpu.memory_space<vmem>>, vector<16x128xf32>
    tpu.vector_store %arg6[%c0_6, %c0_7], %8 {strides = array<i32>} : memref<16x128xf32, #tpu.memory_space<vmem>>, vector<16x128xf32>,
    return
  }
  func.func @transform_0(%arg0: i32, %arg1: i32, %arg2: i32) -> (i32, i32) {
    %c0_i32 = arith.constant 0 : i32
    return %arg0, %arg2 : i32, i32
  }
  func.func @transform_1(%arg0: i32, %arg1: i32, %arg2: i32) -> (i32, i32) {
    %c0_i32 = arith.constant 0 : i32
    return %arg2, %arg1 : i32, i32
  }
  func.func @transform_2(%arg0: i32, %arg1: i32, %arg2: i32) -> (i32, i32) {
    %c0_i32 = arith.constant 0 : i32
    %c0_i32_0 = arith.constant 0 : i32
    return %c0_i32, %arg1 : i32, i32
  }
  func.func @transform_3(%arg0: i32, %arg1: i32, %arg2: i32) -> (i32, i32) {
    %c0_i32 = arith.constant 0 : i32
    return %arg0, %arg1 : i32, i32
  }
}

</mosaic_0001>

<bundles_post_ra>
// kernel: _mlp_forward_padded.1
= control target key start
LH: loop header
LB: loop body
LE: loop exit
PB: predicated region body
PF: predicated region fallthrough
CT: control target
= control target key end

     0   :  { %8 = vsyncpa [#allocation3], 0  ;;  %s206_s15 = smov [#allocation2]   ;;  %s207_s17 = smov 64   ;;  %s244_s0 = inlined_call_operand.vmem [shape: bf16[16,128], index: 0, kind: input, shape index: {}]   ;;  %s245_s1 = inlined_call_operand.hbm [shape: bf16[128,128], index: 1, kind: input, shape index: {}]   ;;  %s246_s2 = inlined_call_operand.vmem [shape: f32[1,128], index: 2, kind: input, shape index: {}]   ;;  %s247_s3 = inlined_call_operand.vmem [shape: f32[16,128], index: 3, kind: output, shape index: {}]  }
   0x1   :  { %s15_s14 = sshll.u32 %s245_s1, 4  ;;  %s17_s16 = sshll.u32 %s206_s15, 4  ;;  %s16_s14 = int_to_ptr.hbm [resolvable:$true] %s15_s14  ;;  %s18_s16 = int_to_ptr.vmem [resolvable:$true] %s17_s16 }
   0x2   :  { %s208_s18 = smov 4  }
   0x3   :  { %23 = dma.hbm_to_vmem [thread:$0]  %s16_s14, 1024, %s18_s16, [#allocation3], %s207_s17, %s207_s17, %s208_s18  }
   0x4   :  { %204 = dma.done.wait [#allocation3], 1024  }
   0x5   :  { %205 = vsyncadd [#allocation3], 4294966272  ;;  %v175_v0 = vld [vmem:[#allocation2 + $0x38] sm:$0xff]  ;;  %v174_v1 = vld [vmem:[#allocation2 + $0x30] sm:$0xff] }
   0x6   :  { %106 = vmatpush.bf16.msra.mxu0 %v175_v0  ;;  %v173_v2 = vld [vmem:[#allocation2 + $0x28] sm:$0xff]  ;;  %v172_v3 = vld [vmem:[#allocation2 + $0x20] sm:$0xff]  ;;  %v171_v4 = vld [vmem:[#allocation2 + $0x18] sm:$0xff] }
   0x7   :  { %v170_v5 = vld [vmem:[#allocation2 + $0x10] sm:$0xff]  ;;  %v169_v6 = vld [vmem:[#allocation2 + $0x8] sm:$0xff]  ;;  %v168_v7 = vld [vmem:[#allocation2] sm:$0xff] }
   0x8   :  { %v167_v8 = vld [vmem:[%s244_s0] sm:$0xff] }
   0x9   :  { %v179_v9 = vld [vmem:[%s246_s2] ss:$0 sm:$0xff] }
   0xa   :  { %107 = vmatpush.bf16.msra.mxu0 %v174_v1 }
   0xe   :  { %108 = vmatpush.bf16.msra.mxu0 %v173_v2 }
  0x12   :  { %109 = vmatpush.bf16.msra.mxu0 %v172_v3 }
  0x16   :  { %110 = vmatpush.bf16.msra.mxu0 %v171_v4 }
  0x1a   :  { %111 = vmatpush.bf16.msra.mxu0 %v170_v5 }
  0x1e   :  { %112 = vmatpush.bf16.msra.mxu0 %v169_v6 }
  0x22   :  { %113 = vmatpush.bf16.msra.mxu0 %v168_v7 }
  0x25   :  { %114 = vmatmul.bf16.vlgmr.msra.gmra.mxu0 %v167_v8 }
  0xa2   :  { %v115_v10 = vpop.f32.mrf.mxu0 }
  0xa3   :  { %v116_v11 = vadd.f32 %v179_v9, %v115_v10 }
  0xa5   :  { %v120_v12 = vmul.f32 0.1, %v116_v11 }
  0xa7   :  { %v122_v13 = vmax.f32 %v116_v11, %v120_v12 }
  0xa9   :  { %124 = vst [vmem:[%s247_s3] sm:$0xff] %v122_v13 }
  0xaa   :  { %v117_v14 = vpop.f32.mrf.mxu0 }
  0xab   :  { %v118_v15 = vadd.f32 %v179_v9, %v117_v14 }
  0xad   :  { %v121_v16 = vmul.f32 0.1, %v118_v15 }
  0xaf   :  { %v123_v17 = vmax.f32 %v118_v15, %v121_v16 }
  0xb1   :  { %125 = vst [vmem:[%s247_s3 + $0x8] sm:$0xff] %v123_v17 }
  0xb2   :  { %130 = vsyncpa [#allocation3], 1 }

</bundles_post_ra>
